<compile_context>
chip_gen: v7x
topology: tpu7x:2x2x1
jax: 0.10.0
libtpu: 0.0.40
codegen_flags: <defaults>
</compile_context>

<pallas_src>
import functools
import math

import jax
import jax.numpy as jnp
from jax.experimental import pallas as pl
from jax.experimental.pallas import tpu as pltpu


# ------------------------------- helpers ------------------------------------

def _largest_divisor_at_most(n, cap):
    cap = max(1, min(n, cap))
    for d in range(cap, 0, -1):
        if n % d == 0:
            return d
    return 1


def _eval_time(H, W):
    # floor(log4(H//16)) with integer arithmetic (avoids float-log rounding), clamped >= 2
    # (eval-mode branch of the module).
    def ilog4(v):
        t = 0
        while v >= 4:
            v //= 4
            t += 1
        return t
    t = max(ilog4(max(H // 16, 1)), ilog4(max(W // 16, 1)))
    return max(t, 2)


def _erf_f32(z):
    # Abramowitz & Stegun 7.1.26, |err| < 1.5e-7: matches PyTorch's exact (erf) GELU in f32.
    a1, a2, a3, a4, a5 = 0.254829592, -0.284496736, 1.421413741, -1.453152027, 1.061405429
    p = 0.3275911
    s = jnp.where(z < 0.0, -1.0, 1.0)
    az = jnp.abs(z)
    t = 1.0 / (1.0 + p * az)
    poly = ((((a5 * t + a4) * t + a3) * t + a2) * t + a1) * t
    return s * (1.0 - poly * jnp.exp(-az * az))


# ----------------------- kernel 1: depthwise 4x4 / s4 ------------------------

def _red4_kernel(x_ref, w_ref, b_ref, o_ref):
    # x: (r, 4, wp, 4*C) -- r output rows, 4 input rows each, wp output cols, 4 taps * C lanes
    # out[i, j, c] = sum_{dy,dx} x[i, dy, j, dx*C + c] * w[dy, dx*C + c] + b[c]
    xb = x_ref[...]
    w = w_ref[...]                                    # (4, 4*C)
    s = jnp.sum(xb * w[None, :, None, :], axis=1)     # (r, wp, 4*C)
    C = o_ref.shape[-1]
    acc = s[..., 0:C] + s[..., C:2 * C] + s[..., 2 * C:3 * C] + s[..., 3 * C:4 * C]
    o_ref[...] = acc + b_ref[...]


def reduction4x4_pallas(x_nhwc, w16c, b, *, target_block_bytes=2 << 20):
    B, Hin, Win, C = x_nhwc.shape
    hp, wp = Hin // 4, Win // 4
    # zero-copy row-major regrouping: (B, Hin, Win, C) -> (B, hp, 4, wp, 4*C)
    xg = x_nhwc.reshape(B, hp, 4, wp, 4 * C)
    wflat = w16c.reshape(4, 4 * C)
    row_bytes = 4 * Win * C * 4                       # bytes of one 4-input-row group (f32)
    r = _largest_divisor_at_most(hp, target_block_bytes // row_bytes)
    return pl.pallas_call(
        _red4_kernel,
        out_shape=jax.ShapeDtypeStruct((B, hp, wp, C), jnp.float32),
        grid=(B, hp // r),
        in_specs=[
            pl.BlockSpec((None, r, 4, wp, 4 * C), lambda bb, i: (bb, i, 0, 0, 0)),
            pl.BlockSpec((4, 4 * C), lambda bb, i: (0, 0)),
            pl.BlockSpec((1, C), lambda bb, i: (0, 0)),
        ],
        out_specs=pl.BlockSpec((None, r, wp, C), lambda bb, i: (bb, i, 0, 0)),
        compiler_params=pltpu.CompilerParams(
            dimension_semantics=("parallel", "parallel")),
    )(xg, wflat, b.reshape(1, C))


# ------------- kernel 2: fused small path on the reduced (h, w) grid ---------

def _small_path_kernel(xr_ref, dww_ref, dwb_ref, cw_ref, cb_ref, lng_ref, lnb_ref,
                       kw_ref, vw_ref, cpw_ref, cpb_ref, qw_ref, pw_ref,
                       wqk_ref, wpv_ref, pad_ref, *, num_heads, scale):
    h, w, C = xr_ref.shape
    cr = cw_ref.shape[1]
    n_kv = h * w
    dqk = cr // num_heads
    dh = C // num_heads

    # zero the padded scratch once; borders stay zero for both depthwise convs
    pad_ref[...] = jnp.zeros_like(pad_ref)

    # ---- dwconv: depthwise 3x3, padding=1, on the reduced feature map ----
    pad_ref[1:1 + h, 1:1 + w, :] = xr_ref[...]
    dww = dww_ref[...]
    acc = jnp.zeros((h, w, C), jnp.float32)
    for dy in range(3):
        for dx in range(3):
            acc = acc + pad_ref[dy:dy + h, dx:dx + w, :] * dww[dy, dx, :]
    acc = acc + dwb_ref[...]

    rows = jnp.concatenate([acc[i] for i in range(h)], axis=0)        # (n_kv, C)

    # ---- 1x1 conv (C -> cr) + LayerNorm + exact GELU (fused epilogue) ----
    y = jnp.dot(rows, cw_ref[...], preferred_element_type=jnp.float32) + cb_ref[...]
    mu = jnp.mean(y, axis=-1, keepdims=True)
    var = jnp.mean((y - mu) ** 2, axis=-1, keepdims=True)
    y = (y - mu) * jax.lax.rsqrt(var + 1e-5) * lng_ref[...] + lnb_ref[...]
    xr2 = 0.5 * y * (1.0 + _erf_f32(y * (1.0 / math.sqrt(2.0))))      # (n_kv, cr)

    # ---- k / v projections share xr2 (fused in one kernel) ----
    k = jnp.dot(xr2, kw_ref[...], preferred_element_type=jnp.float32)  # (n_kv, cr)
    v = jnp.dot(xr2, vw_ref[...], preferred_element_type=jnp.float32)  # (n_kv, C)

    # ---- cpe: depthwise 3x3 over the (h, w) grid of v, folded in here ----
    for i in range(h):
        pad_ref[1 + i, 1:1 + w, :] = v[i * w:(i + 1) * w, :]
    cpw = cpw_ref[...]
    acc2 = jnp.zeros((h, w, C), jnp.float32)
    for dy in range(3):
        for dx in range(3):
            acc2 = acc2 + pad_ref[dy:dy + h, dx:dx + w, :] * cpw[dy, dx, :]
    acc2 = acc2 + cpb_ref[...]
    v = v + jnp.concatenate([acc2[i] for i in range(h)], axis=0)

    # ---- fold heads + q_w + proj_w into two per-batch matrices ----
    hn = num_heads * n_kv

    # W_qk[c, hd*n_kv + m] = scale * sum_{d in head hd} q_w[c, d] * k[m, d]
    k_rep = jnp.concatenate([k] * num_heads, axis=0)                   # (hn, cr)
    rh = jax.lax.broadcasted_iota(jnp.int32, (hn, cr), 0) // n_kv
    ch = jax.lax.broadcasted_iota(jnp.int32, (hn, cr), 1) // dqk
    k_bd = k_rep * (rh == ch).astype(jnp.float32)
    wqk = jax.lax.dot_general(qw_ref[...], k_bd, (((1,), (1,)), ((), ())),
                              preferred_element_type=jnp.float32) * scale
    wqk_ref[...] = wqk                                                 # (C, hn)

    # W_pv[hd*n_kv + m, c'] = sum_{c in head hd} v[m, c] * proj_w[c, c']
    v_rep = jnp.concatenate([v] * num_heads, axis=0)                   # (hn, C)
    rh2 = jax.lax.broadcasted_iota(jnp.int32, (hn, C), 0) // n_kv
    ch2 = jax.lax.broadcasted_iota(jnp.int32, (hn, C), 1) // dh
    v_bd = v_rep * (rh2 == ch2).astype(jnp.float32)
    wpv_ref[...] = jnp.dot(v_bd, pw_ref[...], preferred_element_type=jnp.float32)


def small_path_pallas(xr, params, num_heads, scale):
    B, h, w, C = xr.shape
    cr = params["conv_w"].shape[1]
    hn = num_heads * h * w
    kernel = functools.partial(_small_path_kernel, num_heads=num_heads, scale=scale)
    return pl.pallas_call(
        kernel,
        out_shape=(jax.ShapeDtypeStruct((B, C, hn), jnp.float32),
                   jax.ShapeDtypeStruct((B, hn, C), jnp.float32)),
        grid=(B,),
        in_specs=[
            pl.BlockSpec((None, h, w, C), lambda b: (b, 0, 0, 0)),
            pl.BlockSpec((3, 3, C), lambda b: (0, 0, 0)),
            pl.BlockSpec((1, C), lambda b: (0, 0)),
            pl.BlockSpec((C, cr), lambda b: (0, 0)),
            pl.BlockSpec((1, cr), lambda b: (0, 0)),
            pl.BlockSpec((1, cr), lambda b: (0, 0)),
            pl.BlockSpec((1, cr), lambda b: (0, 0)),
            pl.BlockSpec((cr, cr), lambda b: (0, 0)),
            pl.BlockSpec((cr, C), lambda b: (0, 0)),
            pl.BlockSpec((3, 3, C), lambda b: (0, 0, 0)),
            pl.BlockSpec((1, C), lambda b: (0, 0)),
            pl.BlockSpec((C, cr), lambda b: (0, 0)),
            pl.BlockSpec((C, C), lambda b: (0, 0)),
        ],
        out_specs=(pl.BlockSpec((None, C, hn), lambda b: (b, 0, 0)),
                   pl.BlockSpec((None, hn, C), lambda b: (b, 0, 0))),
        scratch_shapes=[pltpu.VMEM((h + 2, w + 2, C), jnp.float32)],
        compiler_params=pltpu.CompilerParams(dimension_semantics=("parallel",)),
    )(xr, params["dw_w"], params["dw_b"].reshape(1, C),
      params["conv_w"], params["conv_b"].reshape(1, cr),
      params["ln_g"].reshape(1, cr), params["ln_b"].reshape(1, cr),
      params["k_w"], params["v_w"],
      params["cpe_w"], params["cpe_b"].reshape(1, C),
      params["q_w"], params["proj_w"])


# --------- kernel 3: fused q-proj + multi-head attention + out-proj ----------

def _attn_proj_kernel(x_ref, wqk_ref, wpv_ref, pb_ref, o_ref, *, np_kv):
    x = x_ref[...]                                                     # (tq, C)
    s = jnp.dot(x, wqk_ref[...], preferred_element_type=jnp.float32)   # (tq, heads*Np), scaled
    m = jnp.max(s, axis=-1, keepdims=True)                             # global row max is a valid
    p = jnp.exp(s - m)                                                 # stabilizer per head group
    hn = s.shape[-1]
    # per-head softmax denominators via a block-indicator matmul (no reshapes / lane slicing)
    # TODO(synk): for very large h*w the (hn, hn) indicator should be replaced by a per-head loop.
    gi = jax.lax.broadcasted_iota(jnp.int32, (hn, hn), 0) // np_kv
    gj = jax.lax.broadcasted_iota(jnp.int32, (hn, hn), 1) // np_kv
    blk = (gi == gj).astype(jnp.float32)
    denom = jnp.dot(p, blk, preferred_element_type=jnp.float32)        # group sums, replicated
    pn = p / denom
    o_ref[...] = jnp.dot(pn, wpv_ref[...], preferred_element_type=jnp.float32) + pb_ref[...]


def attention_proj_pallas(x2d, wqk, wpv, proj_b, N, n_kv):
    M, C = x2d.shape
    hn = wqk.shape[-1]
    tq = _largest_divisor_at_most(N, 512)
    tiles_per_batch = N // tq
    kernel = functools.partial(_attn_proj_kernel, np_kv=n_kv)
    return pl.pallas_call(
        kernel,
        out_shape=jax.ShapeDtypeStruct((M, C), jnp.float32),
        grid=(M // tq,),
        in_specs=[
            pl.BlockSpec((tq, C), lambda i: (i, 0)),
            pl.BlockSpec((None, C, hn), lambda i: (i // tiles_per_batch, 0, 0)),
            pl.BlockSpec((None, hn, C), lambda i: (i // tiles_per_batch, 0, 0)),
            pl.BlockSpec((1, C), lambda i: (0, 0)),
        ],
        out_specs=pl.BlockSpec((tq, C), lambda i: (i, 0)),
        compiler_params=pltpu.CompilerParams(dimension_semantics=("parallel",)),
    )(x2d, wqk, wpv, proj_b.reshape(1, C))


# ------------------------------ RG_SA forward --------------------------------

def rg_sa_pallas(x, H, W, params, num_heads, c_ratio=0.5):
    B, N, C = x.shape
    head_dim = C // num_heads
    scale = (head_dim * c_ratio) ** -0.5

    _time = _eval_time(H, W)
    _scale = 4 ** _time

    # reduction1 applied _time times (tiled, pipelined, parallel grid)
    cur = x.reshape(B, H, W, C)
    for _ in range(_time):
        cur = reduction4x4_pallas(cur, params["red_w"], params["red_b"])
    h, w = H // _scale, W // _scale
    n_kv = h * w

    # dwconv + 1x1 conv + LN + GELU + k/v + cpe + head/q/proj folding -> per-batch W_qk, W_pv
    wqk, wpv = small_path_pallas(cur, params, num_heads, scale)

    # single pass over the full activation: q-proj + attention + output projection
    out = attention_proj_pallas(x.reshape(B * N, C), wqk, wpv, params["proj_b"], N, n_kv)
    # attn_drop / proj_drop have p=0.0 (eval) -> identity
    return out.reshape(B, N, C)


# --------------------------- pure-JAX reference ------------------------------

def rg_sa_reference(x, H, W, params, num_heads, c_ratio=0.5):
    B, N, C = x.shape
    cr = int(C * c_ratio)
    head_dim = C // num_heads
    scale = (head_dim * c_ratio) ** -0.5
    _time = _eval_time(H, W)
    _scale = 4 ** _time
    dn = ("NHWC", "HWIO", "NHWC")

    cur = x.reshape(B, H, W, C)
    red_w = params["red_w"].reshape(4, 4, 1, C)
    for _ in range(_time):
        cur = jax.lax.conv_general_dilated(cur, red_w, (4, 4), "VALID",
                                           dimension_numbers=dn,
                                           feature_group_count=C) + params["red_b"]
    dw_w = params["dw_w"].reshape(3, 3, 1, C)
    cur = jax.lax.conv_general_dilated(cur, dw_w, (1, 1), "SAME",
                                       dimension_numbers=dn,
                                       feature_group_count=C) + params["dw_b"]
    h, w = H // _scale, W // _scale
    Np = h * w
    y = cur.reshape(B * Np, C) @ params["conv_w"] + params["conv_b"]
    mu = y.mean(-1, keepdims=True)
    var = ((y - mu) ** 2).mean(-1, keepdims=True)
    y = (y - mu) / jnp.sqrt(var + 1e-5) * params["ln_g"] + params["ln_b"]
    _xr = jax.nn.gelu(y, approximate=False)

    q = x.reshape(B * N, C) @ params["q_w"]
    k = _xr @ params["k_w"]
    v = _xr @ params["v_w"]
    cpe_w = params["cpe_w"].reshape(3, 3, 1, C)
    cpe = jax.lax.conv_general_dilated(v.reshape(B, h, w, C), cpe_w, (1, 1), "SAME",
                                       dimension_numbers=dn,
                                       feature_group_count=C) + params["cpe_b"]
    v = v + cpe.reshape(B * Np, C)

    qh = q.reshape(B, N, num_heads, cr // num_heads).transpose(0, 2, 1, 3)
    kh = k.reshape(B, Np, num_heads, cr // num_heads).transpose(0, 2, 1, 3)
    vh = v.reshape(B, Np, num_heads, head_dim).transpose(0, 2, 1, 3)
    attn = jax.nn.softmax(jnp.einsum("bhnd,bhmd->bhnm", qh, kh) * scale, axis=-1)
    out = jnp.einsum("bhnm,bhmd->bhnd", attn, vh)
    out = out.transpose(0, 2, 1, 3).reshape(B * N, C)
    out = out @ params["proj_w"] + params["proj_b"]
    return out.reshape(B, N, C)


# ---------------------------------- params -----------------------------------

def init_params(key, C, c_ratio=0.5):
    cr = int(C * c_ratio)
    ks = jax.random.split(key, 13)
    r = lambda k, s: 0.1 * jax.random.normal(k, s, jnp.float32)
    return dict(
        red_w=r(ks[0], (16, C)), red_b=r(ks[1], (C,)),          # reduction1 (dw 4x4 s4)
        dw_w=r(ks[2], (3, 3, C)), dw_b=r(ks[3], (C,)),          # dwconv
        conv_w=r(ks[4], (C, cr)), conv_b=r(ks[5], (cr,)),       # 1x1 conv dim->cr
        ln_g=jnp.ones((cr,), jnp.float32), ln_b=jnp.zeros((cr,), jnp.float32),
        q_w=r(ks[6], (C, cr)),                                  # qkv_bias=False
        k_w=r(ks[7], (cr, cr)),
        v_w=r(ks[8], (cr, C)),
        cpe_w=r(ks[9], (3, 3, C)), cpe_b=r(ks[10], (C,)),       # cpe (dw 3x3)
        proj_w=r(ks[11], (C, C)), proj_b=r(ks[12], (C,)),
    )


if __name__ == "__main__":
    B, C, H, W = 2, 64, 32, 32
    num_heads = 4
    N = H * W

    key = jax.random.PRNGKey(0)
    kp, kx = jax.random.split(key)
    params = init_params(kp, C)
    x = jax.random.normal(kx, (B, N, C), jnp.float32)

    out = jax.block_until_ready(rg_sa_pallas(x, H, W, params, num_heads))
    assert out.shape == (B, N, C)

    ref = rg_sa_reference(x, H, W, params, num_heads)
    max_err = float(jnp.max(jnp.abs(out - ref)))
    assert max_err < 1e-2, f"mismatch vs reference: max_err={max_err}"
    print("KERNEL_OK")
</pallas_src>

<mosaic_0001>
module attributes {stable_mosaic.version = 11 : i64} {
  func.func @_red4_kernel(%arg0: i32, %arg1: i32, %arg2: memref<1x8x4x8x256xf32, #tpu.memory_space<vmem>>, %arg3: memref<4x256xf32, #tpu.memory_space<vmem>>, %arg4: memref<1x64xf32, #tpu.memory_space<vmem>>, %arg5: memref<1x8x8x64xf32, #tpu.memory_space<vmem>>) attributes {dimension_semantics = [#tpu.dimension_semantics<parallel>, #tpu.dimension_semantics<parallel>], iteration_bounds = array<i64: 2, 1>, scalar_prefetch = 0 : i64, scratch_operands = 0 : i64, tpu.core_type = #tpu.core_type<tc>, window_params = [{transform_indices = @transform_0, window_bounds = array<i64: 1, 8, 4, 8, 256>}, {pipeline_mode = #tpu.pipeline_mode<synchronous>, transform_indices = @transform_1, window_bounds = array<i64: 4, 256>}, {pipeline_mode = #tpu.pipeline_mode<synchronous>, transform_indices = @transform_2, window_bounds = array<i64: 1, 64>}, {transform_indices = @transform_3, window_bounds = array<i64: 1, 8, 8, 64>}]} {
    %c0 = arith.constant 0 : index
    %c0_0 = arith.constant 0 : index
    %c0_1 = arith.constant 0 : index
    %c0_2 = arith.constant 0 : index
    %c0_3 = arith.constant 0 : index
    %0 = vector.load %arg2[%c0, %c0_0, %c0_1, %c0_2, %c0_3] : memref<1x8x4x8x256xf32, #tpu.memory_space<vmem>>, vector<1x8x4x8x256xf32>
    %1 = vector.shape_cast %0 : vector<1x8x4x8x256xf32> to vector<8x4x8x256xf32>
    %c0_4 = arith.constant 0 : index
    %c0_5 = arith.constant 0 : index
    %2 = vector.load %arg3[%c0_4, %c0_5] : memref<4x256xf32, #tpu.memory_space<vmem>>, vector<4x256xf32>
    %3 = vector.shape_cast %2 : vector<4x256xf32> to vector<1x4x1x256xf32>
    %4 = vector.broadcast %3 : vector<1x4x1x256xf32> to vector<8x4x8x256xf32>
    %5 = arith.mulf %1, %4 : vector<8x4x8x256xf32>
    %cst = arith.constant dense<0.000000e+00> : vector<8x8x256xf32>
    %6 = vector.multi_reduction <add>, %5, %cst [1] : vector<8x4x8x256xf32> to vector<8x8x256xf32>
    %7 = vector.extract_strided_slice %6 {offsets = [0, 0, 0], sizes = [8, 8, 64], strides = [1, 1, 1]} : vector<8x8x256xf32> to vector<8x8x64xf32>
    %8 = vector.extract_strided_slice %6 {offsets = [0, 0, 64], sizes = [8, 8, 64], strides = [1, 1, 1]} : vector<8x8x256xf32> to vector<8x8x64xf32>
    %9 = arith.addf %7, %8 : vector<8x8x64xf32>
    %10 = vector.extract_strided_slice %6 {offsets = [0, 0, 128], sizes = [8, 8, 64], strides = [1, 1, 1]} : vector<8x8x256xf32> to vector<8x8x64xf32>
    %11 = arith.addf %9, %10 : vector<8x8x64xf32>
    %12 = vector.extract_strided_slice %6 {offsets = [0, 0, 192], sizes = [8, 8, 64], strides = [1, 1, 1]} : vector<8x8x256xf32> to vector<8x8x64xf32>
    %13 = arith.addf %11, %12 : vector<8x8x64xf32>
    %c0_6 = arith.constant 0 : index
    %c0_7 = arith.constant 0 : index
    %14 = vector.load %arg4[%c0_6, %c0_7] : memref<1x64xf32, #tpu.memory_space<vmem>>, vector<1x64xf32>
    %15 = vector.shape_cast %14 : vector<1x64xf32> to vector<1x1x64xf32>
    %16 = vector.broadcast %15 : vector<1x1x64xf32> to vector<8x8x64xf32>
    %17 = arith.addf %13, %16 : vector<8x8x64xf32>
    %c0_8 = arith.constant 0 : index
    %c0_9 = arith.constant 0 : index
    %c0_10 = arith.constant 0 : index
    %c0_11 = arith.constant 0 : index
    %18 = vector.load %arg5[%c0_8, %c0_9, %c0_10, %c0_11] : memref<1x8x8x64xf32, #tpu.memory_space<vmem>>, vector<1x8x8x64xf32>
    %19 = vector.shape_cast %18 : vector<1x8x8x64xf32> to vector<8x8x64xf32>
    %20 = vector.shape_cast %17 : vector<8x8x64xf32> to vector<1x8x8x64xf32>
    tpu.vector_store %arg5[%c0_8, %c0_9, %c0_10, %c0_11], %20 {strides = array<i32>} : memref<1x8x8x64xf32, #tpu.memory_space<vmem>>, vector<1x8x8x64xf32>,
    return
  }
  func.func @transform_0(%arg0: i32, %arg1: i32) -> (i32, i32, i32, i32, i32) {
    %c0_i32 = arith.constant 0 : i32
    %c0_i32_0 = arith.constant 0 : i32
    %c0_i32_1 = arith.constant 0 : i32
    %c0_i32_2 = arith.constant 0 : i32
    return %arg0, %arg1, %c0_i32, %c0_i32_0, %c0_i32_1 : i32, i32, i32, i32, i32
  }
  func.func @transform_1(%arg0: i32, %arg1: i32) -> (i32, i32) {
    %c0_i32 = arith.constant 0 : i32
    %c0_i32_0 = arith.constant 0 : i32
    %c0_i32_1 = arith.constant 0 : i32
    return %c0_i32, %c0_i32_0 : i32, i32
  }
  func.func @transform_2(%arg0: i32, %arg1: i32) -> (i32, i32) {
    %c0_i32 = arith.constant 0 : i32
    %c0_i32_0 = arith.constant 0 : i32
    %c0_i32_1 = arith.constant 0 : i32
    return %c0_i32, %c0_i32_0 : i32, i32
  }
  func.func @transform_3(%arg0: i32, %arg1: i32) -> (i32, i32, i32, i32) {
    %c0_i32 = arith.constant 0 : i32
    %c0_i32_0 = arith.constant 0 : i32
    %c0_i32_1 = arith.constant 0 : i32
    return %arg0, %arg1, %c0_i32, %c0_i32_0 : i32, i32, i32, i32
  }
}

</mosaic_0001>

<bundles_post_ra>
// kernel: tpu_custom_call.1
= control target key start
LH: loop header
LB: loop body
LE: loop exit
PB: predicated region body
PF: predicated region fallthrough
CT: control target
= control target key end

     0   :  { %8 = vsyncpa [#allocation3], 0  ;;  %s1427_s0 = inlined_call_operand.hbm [shape: f32[2,8,4,8,256], index: 0, kind: input, shape index: {}]   ;;  %s1428_s1 = inlined_call_operand.hbm [shape: f32[4,256], index: 1, kind: input, shape index: {}]   ;;  %s1429_s2 = inlined_call_operand.vmem [shape: f32[1,64], index: 2, kind: input, shape index: {}]   ;;  %s1430_s3 = inlined_call_operand.hbm [shape: f32[2,8,8,64], index: 3, kind: output, shape index: {}]  }
   0x1   :  { %10 = vsyncpa [#allocation3 + $0x1], 0 }
   0x2   :  { %11 = vsyncpa [#allocation6], 0 }
   0x3   :  { %12 = vsyncpa [#allocation4], 0 }
   0x4   :  { %14 = vsyncpa [#allocation4 + $0x1], 0  ;;  %s965_s12 = smov 0   ;;  %s967_s13 = smov 0  }
   0x5   :  { %s969_s14 = smov 0   ;;  %s971_s15 = smov 0  }
   0x6   :  { %s973_s16 = smov 0   ;;  %s975_s17 = smov 0  }
   0x7 LB: > { %s690_s18 = sadd.s32 4294967295, %s934_s17   ;;  %s691_s19 = sadd.s32 4294967294, %s934_s17   ;;  %s934_s17 = sphi %s975_s17, %s20_s17   ;;  %s930_s16 = sphi %s973_s16, %s1458_s16   ;;  %s926_s15 = sphi %s971_s15, %s1457_s15   ;;  %s922_s14 = sphi %s969_s14, %s1456_s14   ;;  %s918_s13 = sphi %s967_s13, %s1455_s13   ;;  %s914_s12 = sphi %s965_s12, %s1454_s12  }
   0x8   : > { %s41_s20 = sadd.s32 1, %s922_s14  ;;  %p48_p0 = scmp.ne.s32.totalorder %s922_s14, %s918_s13 }
   0x9   : > { %p49_p1 = scmp.eq.s32.totalorder %s934_s17, 0  ;;  %p54_p2 = scmp.ne.s32.totalorder %s918_s13, %s914_s12 }
   0xa   : > { %p1003_p3 = scmp.eq.s32.totalorder %s690_s18, 0  ;;  %p122_p4 = scmp.eq.s32.totalorder %s690_s18, 1 }
   0xb   : > { %p1007_p5 = por %p49_p1, %p48_p0  ;;  %p128_p6 = scmp.eq.s32.totalorder %s691_s19, 1 }
   0xc   : > { %s1437_s21 = scalar_select %p1003_p3, 1, 0 }
   0xd   : > { %p1013_p7 = por %p1003_p3, %p54_p2  ;;  %p1017_p8 = por %p122_p4, %p48_p0 }
   0xe   : > { %p1021_p9 = por %p128_p6, %p54_p2  ;;  %p692_p10 = scmp.ge.s32.totalorder %s934_s17, 1 }
   0xf   : > { %s1439_s23 = scalar_select %p1013_p7, 1, 0 }
  0x10   : > { %s1440_s24 = scalar_select %p1017_p8, 1, 0 }
  0x11   : > { %s1441_s25 = scalar_select %p1021_p9, 1, 0 }
  0x12   : > { %p135_p11 = scmp.lt.s32.totalorder %s934_s17, 3  ;;  %s936_s27 = smov [#allocation5]  }
  0x13   : > { %s148_s28 = sshll.u32 %s936_s27, 4  ;;  %p732_p1 = scmp.lt.s32.totalorder %s934_s17, 2  ;;  %s149_s28 = int_to_ptr.vmem [resolvable:$true] %s148_s28 }
  0x14   : > { %p1028_p13 = pnand %p692_p10, %p135_p11  ;;  %s32_s4 = sadd.s32 1, %s930_s16 }
  0x15   : > { %p1037_p4 = pnand %p732_p1, %p1007_p5  ;;  %p1048_p6 = scmp.ge.s32.totalorder %s32_s4, 2 }
  0x16   : > { %s1442_s26 = scalar_select %p1028_p13, 1, 0 }
  0x17   : > { %p719_p0 = pneg %p1028_p13  ;;  %s162_s6 = sand.u32 1, %s922_s14  }
  0x18   : > { %s1443_s29 = scalar_select %p1037_p4, 1, 0 }
  0x19   : > { %p1043_p2 = pnand %p719_p0, %p1003_p3  ;;  %s790_s9 = scalar_lea.hbm %s1428_s1, 128 }
  0x1a   : > { %s1445_s5 = scalar_select %p1048_p6, 1, 0 }
  0x1b   : > { %p791_p5 = scmp.ne.s32.totalorder %s1428_s1, %s790_s9  ;;  %p792_p10 = pneg %p1043_p2 }
  0x1c   : > { %p797_p0 = scmp.lt.u32.totalorder %s790_s9, %s1428_s1 }
  0x1d   : > { %p793_p11 = pnand %p792_p10, %p791_p5 }
  0x1f   : > { %p794_p1 = pneg %p793_p11 }
  0x21   : > { %p799_p12 = pnand %p797_p0, %p794_p1 }
  0x23   : > { %802 = shalt.err (!%p799_p12)
}
  0x24   : > { %s803_s22 = scalar_lea.vmem %s149_s28, 128  ;;  %p811_p7 = scmp.lt.s32.totalorder %s149_s28, %s149_s28 }
  0x25   : > { %p804_p9 = scmp.ne.s32.totalorder %s149_s28, %s803_s22  ;;  %p812_p13 = scmp.lt.s32.totalorder %s803_s22, %s803_s22 }
  0x27   : > { %p806_p8 = pnand %p804_p9, %p792_p10  ;;  %p813_p4 = por %p812_p13, %p811_p7 }
  0x29   : > { %p807_p3 = pneg %p806_p8 }
  0x2b   : > { %p814_p6 = pnand %p813_p4, %p807_p3 }
  0x2d   : > { %817 = shalt.err (!%p814_p6)
}
  0x2e   : > { %722 = dma.hbm_to_vmem [thread:$0]  (!%p1043_p2), %s1428_s1, 128, %s149_s28, [#allocation6]  }
  0x2f   : > { %p1446_p9 = scmp.ne.s32.totalorder %s1445_s5, 0  ;;  %s695_s8 = sshll.u32 %s162_s6, 9 }
  0x30   : > { %s709_s10 = sshll.u32 %s930_s16, 13  ;;  %s166_s19 = scalar_lea.vmem [#allocation2], %s695_s8 }
  0x31   : > { %s1460_s4 = smov (%p1446_p9, %s32_s4), 0  ;;  %s1079_s18 = scalar_lea.hbm %s1427_s0, %s709_s10 }
  0x32   : > { %s36_s9 = ssub.s32 %s930_s16, %s1460_s4  ;;  %s176_s22 = sshll.u32 %s166_s19, 4  ;;  %s1086_s22 = int_to_ptr.vmem [resolvable:$true] %s176_s22 }
  0x33   : > { %p39_p3 = scmp.eq.s32.totalorder %s36_s9, 0  ;;  %s1088_s5 = scalar_lea.sflag [#allocation3], %s162_s6 }
  0x34   : > { %s818_s27 = scalar_lea.hbm %s1079_s18, 8192  ;;  %p1447_p8 = scmp.ne.s32.totalorder %s1443_s29, 0 }
  0x35   : > { %s1084_s28 = scalar_select %p39_p3, %s922_s14, %s41_s20  }
  0x36   : > { %p819_p7 = scmp.ne.s32.totalorder %s1079_s18, %s818_s27  ;;  %p820_p12 = pneg %p1447_p8 }
  0x37   : > { %s823_s8 = scalar_lea.hbm %s1427_s0, 16384  ;;  %p824_p2 = scmp.lt.u32.totalorder %s1079_s18, %s1427_s0 }
  0x38   : > { %p821_p13 = pnand %p820_p12, %p819_p7  ;;  %p825_p6 = scmp.lt.u32.totalorder %s823_s8, %s818_s27 }
  0x39   : > { %p827_p10 = scmp.lt.u32.totalorder %s818_s27, %s1079_s18 }
  0x3a   : > { %p822_p4 = pneg %p821_p13  ;;  %p826_p5 = por %p825_p6, %p824_p2 }
  0x3c   : > { %p828_p11 = por %p827_p10, %p826_p5 }
  0x3e   : > { %p829_p1 = pnand %p828_p11, %p822_p4 }
  0x40   : > { %832 = shalt.err (!%p829_p1)
}
  0x41   : > { %s833_s20 = scalar_lea.vmem %s1086_s22, 8192  ;;  %s937_s6 = smov [#allocation2]  }
  0x42   : > { %p834_p0 = scmp.ne.s32.totalorder %s1086_s22, %s833_s20  ;;  %s838_s11 = sshll.u32 %s937_s6, 4  ;;  %s839_s11 = int_to_ptr.vmem [resolvable:$false] %s838_s11 }
  0x43   : > { %s840_s19 = scalar_lea.vmem %s839_s11, 16384  ;;  %p841_p7 = scmp.lt.s32.totalorder %s1086_s22, %s839_s11 }
  0x44   : > { %p836_p9 = pnand %p834_p0, %p820_p12  ;;  %p842_p13 = scmp.lt.s32.totalorder %s840_s19, %s833_s20 }
  0x46   : > { %p837_p3 = pneg %p836_p9  ;;  %p843_p2 = por %p842_p13, %p841_p7 }
  0x48   : > { %p844_p6 = pnand %p843_p2, %p837_p3 }
  0x4a   : > { %847 = shalt.err (!%p844_p6)
}
  0x4b   : > { %s938_s27 = smov 256   ;;  %s939_s7 = smov 16  }
  0x4c   : > { %726 = dma.hbm_to_vmem [thread:$0]  (!%p1447_p8), %s1079_s18, 8192, %s1086_s22, %s1088_s5, %s938_s27, %s938_s27, %s939_s7  }
  0x4d   : > { %p1448_p12 = scmp.ne.s32.totalorder %s1442_s26, 0 }
  0x4e   : > { %s1119_s9 = sand.u32 (!%p1448_p12), 1, %s918_s13   ;;  %p1449_p4 = scmp.ne.s32.totalorder (!%p1448_p12), %s1439_s23, 0 }
  0x4f   : > { %188 = sbr.rel (%p1448_p12) target bundleno = 273 (0x111), region = 32  ;;  %s699_s8 = sshll.u32 (!%p1448_p12), %s1119_s9, 9 }
  0x50   : > { %s191_s10 = scalar_lea.sflag (!%p1448_p12), [#allocation3], %s1119_s9  ;;  %s1123_s30 = scalar_lea.vmem (!%p1448_p12), [#allocation2], %s699_s8 }
  0x56   : > { %901 = dma.done.wait (%p1449_p4), %s191_s10, 8192  }
  0x57   : > { %903 = vsyncadd (%p1449_p4), %s191_s10, 4294959104  ;;  %p1450_p8 = scmp.ne.s32.totalorder %s1437_s21, 0 }
  0x59   : > { %905 = dma.done.wait (%p1450_p8), [#allocation6], 128  }
  0x5a   : > { %907 = vsyncadd (%p1450_p8), [#allocation6], 4294967168  ;;  %v300_v0 = vlaneseq  ;;  %v940_v1 = vmov 1966171168   ;;  %v239_v11 = vld [vmem:[%s1123_s30 + $0x80] sm:$0xff]  ;;  %v241_v12 = vld [vmem:[%s1123_s30 + $0x90] sm:$0xff] }
  0x5b   : > { %v298_v2 = vunpack.c.l.s4 %v940_v1  ;;  %v702_v7 = vld.sshfl [vmem:[#allocation5] sm:$0xff pattern:$0x75316420]  ;;  %v225_v20 = vld [vmem:[%s1123_s30 + $0x10] sm:$0xff]  ;;  %s941_s21 = smov 64   ;;  %s701_s23 = sshll.u32 %s1119_s9, 6 }
  0x5c   : > { %v301_v3 = vshrl.u32 %v300_v0, 7  ;;  %v296_v9 = vcombine.high %v702_v7, %v702_v7  ;;  %v243_v13 = vld [vmem:[%s1123_s30 + $0xa0] sm:$0xff]  ;;  %v249_v28 = vld [vmem:[%s1123_s30 + $0xd0] sm:$0xff]  ;;  %vm568_vm0 = vcmask 523264   ;;  %s1351_s18 = scalar_lea.vmem [#allocation7], %s701_s23  ;;  %s710_s22 = sshll.u32 %s926_s15, 10 }
  0x5d   : > { %v299_v4 = vunpack.c.0.s8 %v298_v2  ;;  %v223_v17 = vld [vmem:[%s1123_s30] sm:$0xff]  ;;  %v233_v30 = vld [vmem:[%s1123_s30 + $0x50] sm:$0xff]  ;;  %s593_s5 = sshll.u32 %s1351_s18, 4  ;;  %s1372_s11 = scalar_lea.hbm %s1430_s3, %s710_s22  ;;  %s1374_s5 = int_to_ptr.vmem [resolvable:$true] %s593_s5 }
  0x5e   : > { %v315_v6 = vsub.s32 0, %v301_v3  ;;  %v1133_v8 = vsub.s32 1, %v301_v3  ;;  %v247_v18 = vld [vmem:[%s1123_s30 + $0xc0] sm:$0xff]  ;;  %v245_v31 = vld [vmem:[%s1123_s30 + $0xb0] sm:$0xff]  ;;  %s578_s15 = scalar_lea.sflag [#allocation4], %s1119_s9  ;;  %s848_s19 = scalar_lea.vmem %s1374_s5, 1024 }
  0x5f   : > { %v302_v5 = vsub.s32 %v299_v4, %v301_v3  ;;  %v231_v19 = vld [vmem:[%s1123_s30 + $0x40] sm:$0xff]  ;;  %v229_v32 = vld [vmem:[%s1123_s30 + $0x30] sm:$0xff]  ;;  %p849_p5 = scmp.ne.s32.totalorder %s1374_s5, %s848_s19  ;;  %p1451_p10 = scmp.ne.s32.totalorder %s1440_s24, 0 }
  0x60   : > { %v227_v21 = vld [vmem:[%s1123_s30 + $0x20] sm:$0xff]  ;;  %v253_v41 = vld [vmem:[%s1123_s30 + $0xf0] sm:$0xff]  ;;  %s942_s27 = smov [#allocation7]  }
  0x61   : > { %v303_v10 = vrot.slane %v702_v7, %v302_v5  ;;  %v1138_v14 = vrot.slane %v296_v9, %v302_v5  ;;  %v263_v22 = vld [vmem:[%s1123_s30 + $0x140] sm:$0xff]  ;;  %v237_v43 = vld [vmem:[%s1123_s30 + $0x70] sm:$0xff]  ;;  %p850_p11 = pnand %p849_p5, %p1451_p10  ;;  %s852_s7 = sshll.u32 %s942_s27, 4  ;;  %s853_s7 = int_to_ptr.vmem [resolvable:$false] %s852_s7 }
  0x62   : > { %v251_v29 = vld [vmem:[%s1123_s30 + $0xe0] sm:$0xff]  ;;  %v265_v48 = vld [vmem:[%s1123_s30 + $0x150] sm:$0xff]  ;;  %s854_s8 = scalar_lea.vmem %s853_s7, 2048  ;;  %p855_p0 = scmp.lt.s32.totalorder %s1374_s5, %s853_s7 }
  0x63   : > { %v1140_v15 = vcombine.high %v303_v10, %v303_v10  ;;  %v1142_v16 = vrot.slane %v303_v10, %v315_v6  ;;  %v1151_v23 = vrot.slane %v303_v10, %v1133_v8  ;;  %v1155_v24 = vcombine.high %v1138_v14, %v1138_v14  ;;  %v235_v42 = vld [vmem:[%s1123_s30 + $0x60] sm:$0xff]  ;;  %v269_v54 = vld [vmem:[%s1123_s30 + $0x170] sm:$0xff]  ;;  %p851_p1 = pneg %p850_p11  ;;  %p856_p9 = scmp.lt.s32.totalorder %s854_s8, %s848_s19 }
  0x64   : > { %v1158_v25 = vrot.slane %v1138_v14, %v315_v6  ;;  %v267_v53 = vld [vmem:[%s1123_s30 + $0x160] sm:$0xff]  ;;  %v257_v0 = vld [vmem:[%s1123_s30 + $0x110] sm:$0xff] }
  0x65   : > { %v1161_v26 = vrot.slane %v1140_v15, %v315_v6  ;;  %v369_v27 = vmul.f32 %v1142_v16, %v239_v11  ;;  %v353_v33 = vmul.f32 %v1142_v16, %v223_v17  ;;  %v377_v34 = vmul.f32 %v1142_v16, %v247_v18  ;;  %v255_v55 = vld [vmem:[%s1123_s30 + $0x100] sm:$0xff]  ;;  %v261_v2 = vld [vmem:[%s1123_s30 + $0x130] sm:$0xff]  ;;  %p857_p3 = por %p856_p9, %p855_p0 }
  0x66   : > { %v361_v35 = vmul.f32 %v1142_v16, %v231_v19  ;;  %v393_v36 = vmul.f32 %v1142_v16, %v263_v22  ;;  %v1174_v37 = vrot.slane %v1155_v24, %v315_v6  ;;  %v371_v38 = vmul.f32 %v1158_v25, %v241_v12  ;;  %v259_v1 = vld [vmem:[%s1123_s30 + $0x120] sm:$0xff]  ;;  %v285_v18 = vld [vmem:[%s1123_s30 + $0x1f0] sm:$0xff] }
  0x67   : > { %v373_v39 = vmul.f32 %v1161_v26, %v243_v13  ;;  %v355_v40 = vmul.f32 %v1158_v25, %v225_v20  ;;  %v357_v44 = vmul.f32 %v1161_v26, %v227_v21  ;;  %v379_v45 = vmul.f32 %v1158_v25, %v249_v28  ;;  %v279_v7 = vld [vmem:[%s1123_s30 + $0x1c0] sm:$0xff]  ;;  %v281_v13 = vld [vmem:[%s1123_s30 + $0x1d0] sm:$0xff]  ;;  %p858_p7 = pnand %p857_p3, %p851_p1 }
  0x68   : > { %v381_v46 = vmul.f32 %v1161_v26, %v251_v29  ;;  %v363_v47 = vmul.f32 %v1158_v25, %v233_v30  ;;  %v375_v49 = vmul.f32 %v1174_v37, %v245_v31  ;;  %v429_v50 = vadd.f32 %v371_v38, %v369_v27  ;;  %v283_v17 = vld [vmem:[%s1123_s30 + $0x1e0] sm:$0xff]  ;;  %v273_v28 = vld [vmem:[%s1123_s30 + $0x190] sm:$0xff] }
  0x69   : > { %v359_v51 = vmul.f32 %v1174_v37, %v229_v32  ;;  %v417_v52 = vadd.f32 %v355_v40, %v353_v33  ;;  %v383_v56 = vmul.f32 %v1174_v37, %v253_v41  ;;  %v435_v57 = vadd.f32 %v379_v45, %v377_v34  ;;  %v271_v27 = vld [vmem:[%s1123_s30 + $0x180] sm:$0xff]  ;;  %v277_v33 = vld [vmem:[%s1123_s30 + $0x1b0] sm:$0xff] }
  0x6a   : > { %v365_v58 = vmul.f32 %v1161_v26, %v235_v42  ;;  %v367_v59 = vmul.f32 %v1174_v37, %v237_v43  ;;  %v430_v60 = vadd.f32 %v429_v50, %v373_v39  ;;  %v423_v62 = vadd.f32 %v363_v47, %v361_v35  ;;  %v275_v29 = vld [vmem:[%s1123_s30 + $0x1a0] sm:$0xff]  ;;  %v232_v43 = vld [vmem:[%s1123_s30 + $0x48] sm:$0xff] }
  0x6b   : > { %v418_v61 = vadd.f32 %v417_v52, %v357_v44  ;;  %v395_v63 = vmul.f32 %v1158_v25, %v265_v48  ;;  %v436_v3 = vadd.f32 %v435_v57, %v381_v46  ;;  %v397_v4 = vmul.f32 %v1161_v26, %v267_v53  ;;  %v234_v44 = vld [vmem:[%s1123_s30 + $0x58] sm:$0xff]  ;;  %v236_v48 = vld [vmem:[%s1123_s30 + $0x68] sm:$0xff] }
  0x6c   : > { %v399_v5 = vmul.f32 %v1174_v37, %v269_v54  ;;  %v385_v6 = vmul.f32 %v1142_v16, %v255_v55  ;;  %v1203_v9 = vadd.f32 %v430_v60, %v375_v49  ;;  %v424_v11 = vadd.f32 %v423_v62, %v365_v58  ;;  %v238_v49 = vld [vmem:[%s1123_s30 + $0x78] sm:$0xff]  ;;  %v252_v60 = vld [vmem:[%s1123_s30 + $0xe8] sm:$0xff] }
  0x6d   : > { %v1205_v10 = vadd.f32 %v418_v61, %v359_v51  ;;  %v447_v12 = vadd.f32 %v395_v63, %v393_v36  ;;  %v1210_v19 = vadd.f32 %v436_v3, %v383_v56  ;;  %v387_v20 = vmul.f32 %v1158_v25, %v257_v0  ;;  %v228_v51 = vld [vmem:[%s1123_s30 + $0x28] sm:$0xff]  ;;  %v230_v56 = vld [vmem:[%s1123_s30 + $0x38] sm:$0xff] }
  0x6e   : > { %v389_v21 = vmul.f32 %v1161_v26, %v259_v1  ;;  %v391_v22 = vmul.f32 %v1174_v37, %v261_v2  ;;  %477 = vrot.lane.b32.xlu1 %v1203_v9, %s941_s21  ;;  %v1222_v30 = vadd.f32 %v424_v11, %v367_v59  ;;  %v409_v32 = vmul.f32 %v1142_v16, %v279_v7  ;;  %v250_v59 = vld [vmem:[%s1123_s30 + $0xd8] sm:$0xff]  ;;  %v240_v2 = vld [vmem:[%s1123_s30 + $0x88] sm:$0xff] }
  0x6f   : > { %473 = vrot.lane.b32.xlu0 %v1205_v10, %s941_s21  ;;  %v448_v31 = vadd.f32 %v447_v12, %v397_v4  ;;  %v441_v34 = vadd.f32 %v387_v20, %v385_v6  ;;  %v411_v35 = vmul.f32 %v1158_v25, %v281_v13  ;;  %v413_v36 = vmul.f32 %v1161_v26, %v283_v17  ;;  %v254_v61 = vld [vmem:[%s1123_s30 + $0xf8] sm:$0xff]  ;;  %v244_v4 = vld [vmem:[%s1123_s30 + $0xa8] sm:$0xff] }
  0x70   : > { %v415_v38 = vmul.f32 %v1174_v37, %v285_v18  ;;  %v401_v40 = vmul.f32 %v1142_v16, %v271_v27  ;;  %v403_v41 = vmul.f32 %v1158_v25, %v273_v28  ;;  %v405_v42 = vmul.f32 %v1161_v26, %v275_v29  ;;  %v224_v16 = vld [vmem:[%s1123_s30 + $0x8] sm:$0xff]  ;;  %v242_v3 = vld [vmem:[%s1123_s30 + $0x98] sm:$0xff] }
  0x71   : > { %v1229_v39 = vadd.f32 %v448_v31, %v399_v5  ;;  %v442_v45 = vadd.f32 %v441_v34, %v389_v21  ;;  %v459_v46 = vadd.f32 %v411_v35, %v409_v32  ;;  %v407_v47 = vmul.f32 %v1174_v37, %v277_v33  ;;  %v246_v11 = vld [vmem:[%s1123_s30 + $0xb8] sm:$0xff]  ;;  %v264_v20 = vld [vmem:[%s1123_s30 + $0x148] sm:$0xff] }
  0x72   : > { %v1241_v50 = vrot.slane %v1138_v14, %v1133_v8  ;;  %479 = vrot.lane.b32.xlu1 %v1210_v19, %s941_s21  ;;  %v453_v25 = vadd.f32 %v403_v41, %v401_v40  ;;  %v1250_v26 = vrot.slane %v1140_v15, %v1133_v8  ;;  %v1254_v37 = vrot.slane %v1155_v24, %v1133_v8  ;;  %v226_v14 = vld [vmem:[%s1123_s30 + $0x18] sm:$0xff]  ;;  %v248_v15 = vld [vmem:[%s1123_s30 + $0xc8] sm:$0xff] }
  0x73   : > { %475 = vrot.lane.b32.xlu0 %v1222_v30, %s941_s21  ;;  %v1258_v52 = vadd.f32 %v442_v45, %v391_v22  ;;  %v460_v53 = vadd.f32 %v459_v46, %v413_v36  ;;  %v362_v54 = vmul.f32 %v1151_v23, %v232_v43  ;;  %v354_v24 = vmul.f32 %v1151_v23, %v224_v16  ;;  %v266_v21 = vld [vmem:[%s1123_s30 + $0x158] sm:$0xff]  ;;  %v268_v31 = vld [vmem:[%s1123_s30 + $0x168] sm:$0xff] }
  0x74   : > { %v364_v55 = vmul.f32 %v1241_v50, %v234_v44  ;;  %v454_v57 = vadd.f32 %v453_v25, %v405_v42  ;;  %v366_v58 = vmul.f32 %v1250_v26, %v236_v48  ;;  %v368_v8 = vmul.f32 %v1254_v37, %v238_v49  ;;  %v270_v32 = vld [vmem:[%s1123_s30 + $0x178] sm:$0xff]  ;;  %v260_v41 = vld [vmem:[%s1123_s30 + $0x128] sm:$0xff] }
  0x75   : > { %v1270_v62 = vadd.f32 %v460_v53, %v415_v38  ;;  %v356_v0 = vmul.f32 %v1241_v50, %v226_v14  ;;  %v358_v1 = vmul.f32 %v1250_v26, %v228_v51  ;;  %v360_v6 = vmul.f32 %v1254_v37, %v230_v56  ;;  %v256_v38 = vld [vmem:[%s1123_s30 + $0x108] sm:$0xff]  ;;  %v258_v40 = vld [vmem:[%s1123_s30 + $0x118] sm:$0xff] }
  0x76   : > { %v426_v63 = vadd.f32 %v364_v55, %v362_v54  ;;  %483 = vrot.lane.b32.xlu1 %v1229_v39, %s941_s21  ;;  %v1281_v5 = vadd.f32 %v454_v57, %v407_v47  ;;  %v378_v7 = vmul.f32 %v1151_v23, %v248_v15  ;;  %v380_v17 = vmul.f32 %v1241_v50, %v250_v59  ;;  %v262_v45 = vld [vmem:[%s1123_s30 + $0x138] sm:$0xff]  ;;  %v280_v46 = vld [vmem:[%s1123_s30 + $0x1c8] sm:$0xff] }
  0x77   : > { %481 = vrot.lane.b32.xlu0 %v1258_v52, %s941_s21  ;;  %v420_v13 = vadd.f32 %v356_v0, %v354_v24  ;;  %v382_v18 = vmul.f32 %v1250_v26, %v252_v60  ;;  %v384_v22 = vmul.f32 %v1254_v37, %v254_v61  ;;  %v370_v27 = vmul.f32 %v1151_v23, %v240_v2  ;;  %v282_v54 = vld [vmem:[%s1123_s30 + $0x1d8] sm:$0xff]  ;;  %v284_v55 = vld [vmem:[%s1123_s30 + $0x1e8] sm:$0xff] }
  0x78   : > { %v427_v12 = vadd.f32 %v426_v63, %v366_v58  ;;  %v372_v28 = vmul.f32 %v1241_v50, %v242_v3  ;;  %v374_v29 = vmul.f32 %v1250_v26, %v244_v4  ;;  %v438_v35 = vadd.f32 %v380_v17, %v378_v7  ;;  %v272_v56 = vld [vmem:[%s1123_s30 + $0x188] sm:$0xff]  ;;  %v274_v24 = vld [vmem:[%s1123_s30 + $0x198] sm:$0xff] }
  0x79   : > { %v421_v34 = vadd.f32 %v420_v13, %v358_v1  ;;  %v376_v36 = vmul.f32 %v1254_v37, %v246_v11  ;;  %v394_v43 = vmul.f32 %v1151_v23, %v264_v20  ;;  %v396_v44 = vmul.f32 %v1241_v50, %v266_v21  ;;  %v276_v59 = vld [vmem:[%s1123_s30 + $0x1a8] sm:$0xff]  ;;  %v286_v0 = vld [vmem:[%s1123_s30 + $0x1f8] sm:$0xff] }
  0x7a   : > { %v1296_v33 = vadd.f32 %v427_v12, %v368_v8  ;;  %487 = vrot.lane.b32.xlu1 %v1270_v62, %s941_s21  ;;  %v432_v42 = vadd.f32 %v372_v28, %v370_v27  ;;  %v439_v48 = vadd.f32 %v438_v35, %v382_v18  ;;  %v398_v49 = vmul.f32 %v1250_v26, %v268_v31  ;;  %v278_v3 = vld [vmem:[%s1123_s30 + $0x1b8] sm:$0xff] }
  0x7b   : > { %485 = vrot.lane.b32.xlu0 %v1281_v5, %s941_s21  ;;  %v422_v47 = vadd.f32 %v421_v34, %v360_v6  ;;  %v400_v16 = vmul.f32 %v1254_v37, %v270_v32  ;;  %v450_v14 = vadd.f32 %v396_v44, %v394_v43  ;;  %v386_v51 = vmul.f32 %v1151_v23, %v256_v38  ;;  %v703_v44 = vld [vmem:[%s1429_s2] ss:$0 sm:$0xff] }
  0x7c   : > { %v433_v25 = vadd.f32 %v432_v42, %v374_v29  ;;  %v388_v53 = vmul.f32 %v1241_v50, %v258_v40  ;;  %v440_v15 = vadd.f32 %v439_v48, %v384_v22  ;;  %v390_v57 = vmul.f32 %v1250_v26, %v260_v41 }
  0x7d   : > { %v392_v58 = vmul.f32 %v1254_v37, %v262_v45  ;;  %v410_v8 = vmul.f32 %v1151_v23, %v280_v46  ;;  %v451_v61 = vadd.f32 %v450_v14, %v398_v49  ;;  %v412_v1 = vmul.f32 %v1241_v50, %v282_v54 }
  0x7e   : > { %523 = vrot.lane.b32.xlu1 %v1296_v33, %s941_s21  ;;  %v434_v60 = vadd.f32 %v433_v25, %v376_v36  ;;  %v444_v63 = vadd.f32 %v388_v53, %v386_v51  ;;  %v414_v2 = vmul.f32 %v1250_v26, %v284_v55  ;;  %v402_v4 = vmul.f32 %v1151_v23, %v272_v56 }
  0x7f   : > { %521 = vrot.lane.b32.xlu0 %v422_v47, %s941_s21  ;;  %v404_v7 = vmul.f32 %v1241_v50, %v274_v24  ;;  %v406_v11 = vmul.f32 %v1250_v26, %v276_v59  ;;  %v452_v12 = vadd.f32 %v451_v61, %v400_v16  ;;  %v416_v13 = vmul.f32 %v1254_v37, %v286_v0 }
  0x80   : > { %v445_v6 = vadd.f32 %v444_v63, %v390_v57  ;;  %v462_v17 = vadd.f32 %v412_v1, %v410_v8  ;;  %v408_v20 = vmul.f32 %v1254_v37, %v278_v3 }
  0x81   : > { %v456_v21 = vadd.f32 %v404_v7, %v402_v4 }
  0x82   : > { %527 = vrot.lane.b32.xlu1 %v440_v15, %s941_s21  ;;  %v446_v18 = vadd.f32 %v445_v6, %v392_v58  ;;  %v463_v22 = vadd.f32 %v462_v17, %v414_v2 }
  0x83   : > { %525 = vrot.lane.b32.xlu0 %v434_v60, %s941_s21  ;;  %v457_v27 = vadd.f32 %v456_v21, %v406_v11 }
  0x84   : > { %v464_v23 = vadd.f32 %v463_v22, %v416_v13 }
  0x85   : > { %v458_v50 = vadd.f32 %v457_v27, %v408_v20 }
  0x86   : > { %531 = vrot.lane.b32.xlu1 %v452_v12, %s941_s21 }
  0x87   : > { %529 = vrot.lane.b32.xlu0 %v446_v18, %s941_s21 }
  0x8a   : > { %535 = vrot.lane.b32.xlu1 %v464_v23, %s941_s21 }
  0x8b   : > { %533 = vrot.lane.b32.xlu0 %v458_v50, %s941_s21 }
  0xe0   : > { %v478_v26 = vpop.permute.xlu1 %477 }
  0xe1   : > { %v474_v28 = vpop.permute.xlu0 %473  ;;  %v499_v40 = vadd.f32 %v478_v26, %v1203_v9 }
  0xe2   : > { %v497_v34 = vadd.f32 %v474_v28, %v1205_v10 }
  0xe3   : > { %v507_v25 = vadd.f32 %v499_v40, %v434_v60 }
  0xe4   : > { %v480_v29 = vpop.permute.xlu1 %479  ;;  %v505_v43 = vadd.f32 %v497_v34, %v422_v47 }
  0xe5   : > { %v476_v31 = vpop.permute.xlu0 %475  ;;  %v500_v41 = vadd.f32 %v480_v29, %v1210_v19 }
  0xe6   : > { %v498_v35 = vadd.f32 %v476_v31, %v1222_v30 }
  0xe7   : > { %v508_v19 = vadd.f32 %v500_v41, %v440_v15 }
  0xe8   : > { %v484_v32 = vpop.permute.xlu1 %483  ;;  %v506_v42 = vadd.f32 %v498_v35, %v1296_v33 }
  0xe9   : > { %v482_v37 = vpop.permute.xlu0 %481  ;;  %v502_v30 = vadd.f32 %v484_v32, %v1229_v39 }
  0xea   : > { %v501_v49 = vadd.f32 %v482_v37, %v1258_v52 }
  0xeb   : > { %v510_v52 = vadd.f32 %v502_v30, %v452_v12 }
  0xec   : > { %v488_v36 = vpop.permute.xlu1 %487  ;;  %v509_v51 = vadd.f32 %v501_v49, %v446_v18 }
  0xed   : > { %v486_v38 = vpop.permute.xlu0 %485  ;;  %v504_v53 = vadd.f32 %v488_v36, %v1270_v62 }
  0xee   : > { %v503_v54 = vadd.f32 %v486_v38, %v1281_v5 }
  0xef   : > { %v512_v60 = vadd.f32 %v504_v53, %v464_v23 }
  0xf0   : > { %v524_v45 = vpop.permute.xlu1 %523  ;;  %v511_v62 = vadd.f32 %v503_v54, %v458_v50 }
  0xf1   : > { %v522_v46 = vpop.permute.xlu0 %521  ;;  %v546_v48 = vadd.f32 %v524_v45, %v506_v42 }
  0xf2   : > { %v545_v10 = vadd.f32 %v522_v46, %v505_v43 }
  0xf3   : > { %v561_v9 = vadd.f32 %v703_v44, %v546_v48 }
  0xf4   : > { %v560_v16 = vadd.f32 %v703_v44, %v545_v10  ;;  %v528_v14 = vpop.permute.xlu1 %527 }
  0xf5   : > { %v526_v33 = vpop.permute.xlu0 %525  ;;  %570 = vst.msk [vmem:[%s1351_s18 + $0x8] sm:$0xff] %vm568_vm0, %v561_v9  ;;  %v548_v39 = vadd.f32 %v528_v14, %v508_v19 }
  0xf6   : > { %569 = vst.msk [vmem:[%s1351_s18] sm:$0xff] %vm568_vm0, %v560_v16  ;;  %v547_v47 = vadd.f32 %v526_v33, %v507_v25 }
  0xf7   : > { %v563_v55 = vadd.f32 %v703_v44, %v548_v39 }
  0xf8   : > { %v562_v56 = vadd.f32 %v703_v44, %v547_v47  ;;  %v532_v15 = vpop.permute.xlu1 %531 }
  0xf9   : > { %v530_v57 = vpop.permute.xlu0 %529  ;;  %572 = vst.msk [vmem:[%s1351_s18 + $0x18] sm:$0xff] %vm568_vm0, %v563_v55  ;;  %v550_v58 = vadd.f32 %v532_v15, %v510_v52 }
  0xfa   : > { %571 = vst.msk [vmem:[%s1351_s18 + $0x10] sm:$0xff] %vm568_vm0, %v562_v56  ;;  %v549_v8 = vadd.f32 %v530_v57, %v509_v51 }
  0xfb   : > { %v565_v24 = vadd.f32 %v703_v44, %v550_v58 }
  0xfc   : > { %v564_v59 = vadd.f32 %v703_v44, %v549_v8  ;;  %v536_v5 = vpop.permute.xlu1 %535 }
  0xfd   : > { %v534_v61 = vpop.permute.xlu0 %533  ;;  %574 = vst.msk [vmem:[%s1351_s18 + $0x28] sm:$0xff] %vm568_vm0, %v565_v24  ;;  %v552_v63 = vadd.f32 %v536_v5, %v512_v60 }
  0xfe   : > { %573 = vst.msk [vmem:[%s1351_s18 + $0x20] sm:$0xff] %vm568_vm0, %v564_v59  ;;  %v551_v0 = vadd.f32 %v534_v61, %v511_v62 }
  0xff   : > { %v567_v1 = vadd.f32 %v703_v44, %v552_v63 }
 0x100   : > { %v566_v2 = vadd.f32 %v703_v44, %v551_v0 }
 0x101   : > { %576 = vst.msk [vmem:[%s1351_s18 + $0x38] sm:$0xff] %vm568_vm0, %v567_v1 }
 0x102   : > { %575 = vst.msk [vmem:[%s1351_s18 + $0x30] sm:$0xff] %vm568_vm0, %v566_v2 }
 0x103   : > { %861 = shalt.err (!%p858_p7)
}
 0x104   : > { %s862_s10 = scalar_lea.hbm %s1372_s11, 1024  ;;  %s866_s23 = scalar_lea.hbm %s1430_s3, 2048 }
 0x105   : > { %p863_p13 = scmp.ne.s32.totalorder %s1372_s11, %s862_s10  ;;  %p867_p12 = scmp.lt.u32.totalorder %s1372_s11, %s1430_s3 }
 0x106   : > { %p868_p4 = scmp.lt.u32.totalorder %s866_s23, %s862_s10  ;;  %p870_p5 = scmp.lt.u32.totalorder %s862_s10, %s1372_s11 }
 0x107   : > { %p864_p2 = pnand %p863_p13, %p1451_p10 }
 0x108   : > { %p869_p8 = por %p868_p4, %p867_p12 }
 0x109   : > { %p865_p6 = pneg %p864_p2 }
 0x10a   : > { %p871_p11 = por %p870_p5, %p869_p8 }
 0x10c   : > { %p872_p1 = pnand %p871_p11, %p865_p6 }
 0x10e   : > { %875 = shalt.err (!%p872_p1)
}
 0x10f   : > { %s943_s18 = smov 128   ;;  %s944_s22 = smov 8  }
 0x110   : > { %717 = dma.vmem_to_hbm [thread:$0]  (%p1451_p10), %s1374_s5, 1024, %s1372_s11, %s578_s15, %s943_s18, %s943_s18, %s944_s22  }
 0x111 PF: > { %s608_s20 = sand.u32 1, %s914_s12   ;;  %p1452_p0 = scmp.ne.s32.totalorder %s1441_s25, 0 }
 0x112   : > { %p1453_p9 = scmp.ge.s32.totalorder %s934_s17, 2  ;;  %s609_s6 = scalar_lea.sflag [#allocation4], %s608_s20 }
 0x114   : > { %p728_p3 = pnand %p1453_p9, %p1452_p0 }
 0x116   : > { %909 = dma.done.wait (!%p728_p3), %s609_s6, 1024  }
 0x117   : > { %911 = vsyncadd (!%p728_p3), %s609_s6, 4294966272  ;;  %s20_s17 = sadd.s32 1, %s934_s17   ;;  %s1454_s12 = smov %s918_s13 }
 0x118   : > { %p17_p7 = scmp.ge.s32.totalorder %s20_s17, 4   ;;  %s1455_s13 = smov %s922_s14 }
 0x119   : > { %s1456_s14 = smov %s1084_s28  ;;  %s1457_s15 = smov %s930_s16 }
 0x11a   : > { %s1458_s16 = smov %s1460_s4  ;;  %19 = sbr.rel (!%p17_p7) target bundleno = 7 (0x7), region = 81 }
 0x121   :  { %614 = vsyncpa [#allocation3], 1 }
 0x122   :  { %616 = vsyncpa [#allocation3 + $0x1], 1 }
 0x123   :  { %617 = vsyncpa [#allocation6], 1 }
 0x124   :  { %618 = vsyncpa [#allocation4], 1 }
 0x125   :  { %620 = vsyncpa [#allocation4 + $0x1], 1 }

</bundles_post_ra>
